<compile_context>
chip_gen: v5e
topology: v5e:2x2
jax: 0.10.0
libtpu: 0.0.40
codegen_flags: <defaults>
</compile_context>

<pallas_src>
import jax
import jax.numpy as jnp
from jax.experimental import pallas as pl
from jax.experimental.pallas import tpu as pltpu


def rlstm_seq_kernel(h0_ref, c0_ref, x_ref, w_ref, b_ref,
                     hseq_ref, cseq_ref,
                     xh_ref, h_ref, c_ref):
    """One timestep of the residual LSTM recurrence (grid axis 0 = time)."""
    t = pl.program_id(0)
    H = h0_ref.shape[1]
    I = x_ref.shape[2]          # x block is (1, B, I)

    # Carry init: load h0/c0 into the persistent VMEM scratch on the first step.
    @pl.when(t == 0)
    def _():
        h_ref[...] = h0_ref[...]
        c_ref[...] = c0_ref[...]

    # Stage [x_t | h_{t-1}] into one (B, I+H) operand -> single MXU pass.
    xh_ref[:, :I] = x_ref[0]
    xh_ref[:, I:] = h_ref[...]

    # One fused matmul: all 4 gates + residual branch in 5H output lanes.
    preact = (jnp.dot(xh_ref[...], w_ref[...],
                      preferred_element_type=jnp.float32)
              + b_ref[...])

    # One wide sigmoid over the contiguous [f | i | o] block, then static slices.
    gates = jax.nn.sigmoid(preact[:, :3 * H])
    f_t = gates[:, 0 * H:1 * H]
    i_t = gates[:, 1 * H:2 * H]
    o_t = gates[:, 2 * H:3 * H]
    c_tilde = jnp.tanh(preact[:, 3 * H:4 * H])
    x_res = preact[:, 4 * H:5 * H]      # x @ Wr + br (h-rows of that column block are zero)

    c_prev = c_ref[...]
    c_t = f_t * c_prev + i_t * c_tilde
    h_t = o_t * jnp.tanh(c_t) + x_res

    # Update the carried state and emit this step's outputs.
    h_ref[...] = h_t
    c_ref[...] = c_t
    hseq_ref[0] = h_t.astype(hseq_ref.dtype)
    cseq_ref[0] = c_t.astype(cseq_ref.dtype)


def pack_params(w_gates, b_gates, w_res, b_res):
    """Pack per-gate parameters ONCE (hoisted out of the per-call path).

    w_gates: (4, I+H, H)  gate order [forget, input, output, cell]
    b_gates: (4, H)
    w_res:   (I, H)
    b_res:   (H,)

    Returns:
      w_all: (I+H, 5H)  columns = [f | i | o | c | residual]; the residual
             column block has zeros in its h-rows so h contributes nothing.
      b_all: (1, 5H)
    """
    IH, H = w_gates.shape[1], w_gates.shape[2]
    I = w_res.shape[0]
    w_res_full = jnp.concatenate(
        [w_res, jnp.zeros((IH - I, H), dtype=w_res.dtype)], axis=0)           # (I+H, H)
    w_all = jnp.concatenate(
        [w_gates[0], w_gates[1], w_gates[2], w_gates[3], w_res_full], axis=1)  # (I+H, 5H)
    b_all = jnp.concatenate(
        [b_gates[0], b_gates[1], b_gates[2], b_gates[3], b_res], axis=0
    ).reshape(1, 5 * H)
    return w_all, b_all


def rlstm_sequence(x_seq, h0, c0, w_all, b_all):
    """Run the residual-LSTM cell over a whole sequence in one pallas_call.

    x_seq: (T, B, I), h0/c0: (B, H), w_all: (I+H, 5H), b_all: (1, 5H)
    Returns (h_seq, c_seq), each (T, B, H).
    """
    T, B, I = x_seq.shape
    H = h0.shape[1]

    return pl.pallas_call(
        rlstm_seq_kernel,
        out_shape=(jax.ShapeDtypeStruct((T, B, H), jnp.float32),
                   jax.ShapeDtypeStruct((T, B, H), jnp.float32)),
        grid_spec=pltpu.PrefetchScalarGridSpec(
            num_scalar_prefetch=0,
            grid=(T,),
            in_specs=[
                pl.BlockSpec((B, H), lambda t: (0, 0)),           # h0 (resident)
                pl.BlockSpec((B, H), lambda t: (0, 0)),           # c0 (resident)
                pl.BlockSpec((1, B, I), lambda t: (t, 0, 0)),     # x_t (streamed per step)
                pl.BlockSpec((I + H, 5 * H), lambda t: (0, 0)),   # packed weights (resident)
                pl.BlockSpec((1, 5 * H), lambda t: (0, 0)),       # packed bias   (resident)
            ],
            out_specs=(
                pl.BlockSpec((1, B, H), lambda t: (t, 0, 0)),     # h_seq
                pl.BlockSpec((1, B, H), lambda t: (t, 0, 0)),     # c_seq
            ),
            scratch_shapes=[
                pltpu.VMEM((B, I + H), jnp.float32),   # [x | h] staging buffer
                pltpu.VMEM((B, H), jnp.float32),       # carried h
                pltpu.VMEM((B, H), jnp.float32),       # carried c
            ],
        ),
        compiler_params=pltpu.CompilerParams(
            dimension_semantics=("arbitrary",)),       # T is a recurrence -> serial
    )(h0, c0, x_seq, w_all, b_all)


def rlstm_cell(x, h_prev, c_prev, w_all, b_all):
    """Single-step forward, exactly matching the PyTorch module's forward()."""
    h_seq, c_seq = rlstm_sequence(x[None], h_prev, c_prev, w_all, b_all)
    return h_seq[0], c_seq[0]


def rlstm_cell_ref(x, h_prev, c_prev, w_gates, b_gates, w_res, b_res):
    """Pure-JAX reference mirroring the PyTorch forward exactly."""
    combined = jnp.concatenate([x, h_prev], axis=1)
    f_t = jax.nn.sigmoid(combined @ w_gates[0] + b_gates[0])
    i_t = jax.nn.sigmoid(combined @ w_gates[1] + b_gates[1])
    o_t = jax.nn.sigmoid(combined @ w_gates[2] + b_gates[2])
    c_tilde = jnp.tanh(combined @ w_gates[3] + b_gates[3])
    c_t = f_t * c_prev + i_t * c_tilde
    h_t = o_t * jnp.tanh(c_t) + (x @ w_res + b_res)
    return h_t, c_t


if __name__ == "__main__":
    T = 8
    B = 8
    INPUT_SIZE = 32
    HIDDEN_SIZE = 32

    key = jax.random.PRNGKey(0)
    keys = jax.random.split(key, 7)

    x_seq = jax.random.normal(keys[0], (T, B, INPUT_SIZE), dtype=jnp.float32)
    h0 = jax.random.normal(keys[1], (B, HIDDEN_SIZE), dtype=jnp.float32)
    c0 = jax.random.normal(keys[2], (B, HIDDEN_SIZE), dtype=jnp.float32)

    # Deterministic parameter init mimicking nn.Linear's small-uniform init.
    # Gate order = [forget, input, output, cell].
    bound_g = 1.0 / jnp.sqrt(INPUT_SIZE + HIDDEN_SIZE)
    w_gates = jax.random.uniform(
        keys[3], (4, INPUT_SIZE + HIDDEN_SIZE, HIDDEN_SIZE),
        minval=-bound_g, maxval=bound_g, dtype=jnp.float32)
    b_gates = jax.random.uniform(
        keys[4], (4, HIDDEN_SIZE),
        minval=-bound_g, maxval=bound_g, dtype=jnp.float32)
    bound_r = 1.0 / jnp.sqrt(INPUT_SIZE)
    w_res = jax.random.uniform(
        keys[5], (INPUT_SIZE, HIDDEN_SIZE),
        minval=-bound_r, maxval=bound_r, dtype=jnp.float32)
    b_res = jax.random.uniform(
        keys[6], (HIDDEN_SIZE,),
        minval=-bound_r, maxval=bound_r, dtype=jnp.float32)

    # Pack once (hoisted out of the per-call path).
    w_all, b_all = pack_params(w_gates, b_gates, w_res, b_res)
    w_all, b_all = jax.block_until_ready((w_all, b_all))

    # Fused whole-sequence kernel.
    h_seq, c_seq = rlstm_sequence(x_seq, h0, c0, w_all, b_all)
    jax.block_until_ready((h_seq, c_seq))

    # Reference: step the pure-JAX cell over the sequence.
    h_ref, c_ref = h0, c0
    h_refs, c_refs = [], []
    for t in range(T):
        h_ref, c_ref = rlstm_cell_ref(x_seq[t], h_ref, c_ref,
                                      w_gates, b_gates, w_res, b_res)
        h_refs.append(h_ref)
        c_refs.append(c_ref)
    h_ref_seq = jnp.stack(h_refs, axis=0)
    c_ref_seq = jnp.stack(c_refs, axis=0)

    assert jnp.allclose(h_seq, h_ref_seq, atol=1e-4, rtol=1e-4)
    assert jnp.allclose(c_seq, c_ref_seq, atol=1e-4, rtol=1e-4)

    # Single-step path (exact analogue of the PyTorch module's forward()).
    h1, c1 = rlstm_cell(x_seq[0], h0, c0, w_all, b_all)
    jax.block_until_ready((h1, c1))
    h1_ref, c1_ref = rlstm_cell_ref(x_seq[0], h0, c0,
                                    w_gates, b_gates, w_res, b_res)
    assert jnp.allclose(h1, h1_ref, atol=1e-4, rtol=1e-4)
    assert jnp.allclose(c1, c1_ref, atol=1e-4, rtol=1e-4)

    print("KERNEL_OK")
</pallas_src>

<mosaic_0001>
module attributes {stable_mosaic.version = 11 : i64} {
  func.func @rlstm_seq_kernel(%arg0: i32, %arg1: memref<8x32xf32, #tpu.memory_space<vmem>>, %arg2: memref<8x32xf32, #tpu.memory_space<vmem>>, %arg3: memref<1x8x32xf32, #tpu.memory_space<vmem>>, %arg4: memref<64x160xf32, #tpu.memory_space<vmem>>, %arg5: memref<1x160xf32, #tpu.memory_space<vmem>>, %arg6: memref<1x8x32xf32, #tpu.memory_space<vmem>>, %arg7: memref<1x8x32xf32, #tpu.memory_space<vmem>>, %arg8: memref<8x64xf32, #tpu.memory_space<vmem>>, %arg9: memref<8x32xf32, #tpu.memory_space<vmem>>, %arg10: memref<8x32xf32, #tpu.memory_space<vmem>>) attributes {dimension_semantics = [#tpu.dimension_semantics<arbitrary>], iteration_bounds = array<i64: 8>, scalar_prefetch = 0 : i64, scratch_operands = 3 : i64, tpu.core_type = #tpu.core_type<tc>, window_params = [{pipeline_mode = #tpu.pipeline_mode<synchronous>, transform_indices = @transform_0, window_bounds = array<i64: 8, 32>}, {pipeline_mode = #tpu.pipeline_mode<synchronous>, transform_indices = @transform_1, window_bounds = array<i64: 8, 32>}, {transform_indices = @transform_2, window_bounds = array<i64: 1, 8, 32>}, {pipeline_mode = #tpu.pipeline_mode<synchronous>, transform_indices = @transform_3, window_bounds = array<i64: 64, 160>}, {pipeline_mode = #tpu.pipeline_mode<synchronous>, transform_indices = @transform_4, window_bounds = array<i64: 1, 160>}, {transform_indices = @transform_5, window_bounds = array<i64: 1, 8, 32>}, {transform_indices = @transform_6, window_bounds = array<i64: 1, 8, 32>}]} {
    %c0_i32 = arith.constant 0 : i32
    %0 = arith.cmpi eq, %arg0, %c0_i32 : i32
    %1 = arith.extui %0 : i1 to i32
    %c0_i32_0 = arith.constant 0 : i32
    %2 = arith.cmpi ne, %1, %c0_i32_0 : i32
    scf.if %2 {
      %c0_27 = arith.constant 0 : index
      %c0_28 = arith.constant 0 : index
      %41 = vector.load %arg1[%c0_27, %c0_28] : memref<8x32xf32, #tpu.memory_space<vmem>>, vector<8x32xf32>
      %c0_29 = arith.constant 0 : index
      %c0_30 = arith.constant 0 : index
      %42 = vector.load %arg9[%c0_29, %c0_30] : memref<8x32xf32, #tpu.memory_space<vmem>>, vector<8x32xf32>
      tpu.vector_store %arg9[%c0_29, %c0_30], %41 {strides = array<i32>} : memref<8x32xf32, #tpu.memory_space<vmem>>, vector<8x32xf32>,
      %c0_31 = arith.constant 0 : index
      %c0_32 = arith.constant 0 : index
      %43 = vector.load %arg2[%c0_31, %c0_32] : memref<8x32xf32, #tpu.memory_space<vmem>>, vector<8x32xf32>
      %c0_33 = arith.constant 0 : index
      %c0_34 = arith.constant 0 : index
      %44 = vector.load %arg10[%c0_33, %c0_34] : memref<8x32xf32, #tpu.memory_space<vmem>>, vector<8x32xf32>
      tpu.vector_store %arg10[%c0_33, %c0_34], %43 {strides = array<i32>} : memref<8x32xf32, #tpu.memory_space<vmem>>, vector<8x32xf32>,
    } else {
    }
    %c0 = arith.constant 0 : index
    %c0_1 = arith.constant 0 : index
    %c0_2 = arith.constant 0 : index
    %3 = vector.load %arg3[%c0, %c0_1, %c0_2] : memref<1x8x32xf32, #tpu.memory_space<vmem>>, vector<1x8x32xf32>
    %4 = vector.shape_cast %3 : vector<1x8x32xf32> to vector<8x32xf32>
    %c0_3 = arith.constant 0 : index
    %c0_4 = arith.constant 0 : index
    %5 = vector.load %arg8[%c0_3, %c0_4] : memref<8x64xf32, #tpu.memory_space<vmem>>, vector<8x32xf32>
    tpu.vector_store %arg8[%c0_3, %c0_4], %4 {strides = array<i32>} : memref<8x64xf32, #tpu.memory_space<vmem>>, vector<8x32xf32>,
    %c0_5 = arith.constant 0 : index
    %c0_6 = arith.constant 0 : index
    %6 = vector.load %arg9[%c0_5, %c0_6] : memref<8x32xf32, #tpu.memory_space<vmem>>, vector<8x32xf32>
    %c0_7 = arith.constant 0 : index
    %c32 = arith.constant 32 : index
    %7 = vector.load %arg8[%c0_7, %c32] : memref<8x64xf32, #tpu.memory_space<vmem>>, vector<8x32xf32>
    tpu.vector_store %arg8[%c0_7, %c32], %6 {strides = array<i32>} : memref<8x64xf32, #tpu.memory_space<vmem>>, vector<8x32xf32>,
    %c0_8 = arith.constant 0 : index
    %c0_9 = arith.constant 0 : index
    %8 = vector.load %arg8[%c0_8, %c0_9] : memref<8x64xf32, #tpu.memory_space<vmem>>, vector<8x64xf32>
    %c0_10 = arith.constant 0 : index
    %c0_11 = arith.constant 0 : index
    %9 = vector.load %arg4[%c0_10, %c0_11] : memref<64x160xf32, #tpu.memory_space<vmem>>, vector<64x160xf32>
    %cst = arith.constant dense<0.000000e+00> : vector<8x160xf32>
    %10 = tpu.matmul %8, %9, %cst {dimension_numbers = #tpu.dot_dimension_numbers<[1], [0], [0], [1], [0, 0, 1, 1], [], []>} : vector<8x64xf32>, vector<64x160xf32>, vector<8x160xf32> -> vector<8x160xf32>
    %c0_12 = arith.constant 0 : index
    %c0_13 = arith.constant 0 : index
    %11 = vector.load %arg5[%c0_12, %c0_13] : memref<1x160xf32, #tpu.memory_space<vmem>>, vector<1x160xf32>
    %12 = vector.broadcast %11 : vector<1x160xf32> to vector<8x160xf32>
    %13 = arith.addf %10, %12 : vector<8x160xf32>
    %14 = vector.extract_strided_slice %13 {offsets = [0, 0], sizes = [8, 96], strides = [1, 1]} : vector<8x160xf32> to vector<8x96xf32>
    %15 = arith.negf %14 : vector<8x96xf32>
    %16 = math.exp %15 : vector<8x96xf32>
    %cst_14 = arith.constant 1.000000e+00 : f32
    %17 = vector.broadcast %cst_14 : f32 to vector<8x96xf32>
    %18 = arith.addf %17, %16 : vector<8x96xf32>
    %19 = arith.divf %17, %18 : vector<8x96xf32>
    %20 = vector.extract_strided_slice %19 {offsets = [0, 0], sizes = [8, 32], strides = [1, 1]} : vector<8x96xf32> to vector<8x32xf32>
    %21 = vector.extract_strided_slice %19 {offsets = [0, 32], sizes = [8, 32], strides = [1, 1]} : vector<8x96xf32> to vector<8x32xf32>
    %22 = vector.extract_strided_slice %19 {offsets = [0, 64], sizes = [8, 32], strides = [1, 1]} : vector<8x96xf32> to vector<8x32xf32>
    %23 = vector.extract_strided_slice %13 {offsets = [0, 96], sizes = [8, 32], strides = [1, 1]} : vector<8x160xf32> to vector<8x32xf32>
    %24 = math.tanh %23 : vector<8x32xf32>
    %25 = vector.extract_strided_slice %13 {offsets = [0, 128], sizes = [8, 32], strides = [1, 1]} : vector<8x160xf32> to vector<8x32xf32>
    %c0_15 = arith.constant 0 : index
    %c0_16 = arith.constant 0 : index
    %26 = vector.load %arg10[%c0_15, %c0_16] : memref<8x32xf32, #tpu.memory_space<vmem>>, vector<8x32xf32>
    %27 = arith.mulf %20, %26 : vector<8x32xf32>
    %28 = arith.mulf %21, %24 : vector<8x32xf32>
    %29 = arith.addf %27, %28 : vector<8x32xf32>
    %30 = math.tanh %29 : vector<8x32xf32>
    %31 = arith.mulf %22, %30 : vector<8x32xf32>
    %32 = arith.addf %31, %25 : vector<8x32xf32>
    %c0_17 = arith.constant 0 : index
    %c0_18 = arith.constant 0 : index
    %33 = vector.load %arg9[%c0_17, %c0_18] : memref<8x32xf32, #tpu.memory_space<vmem>>, vector<8x32xf32>
    tpu.vector_store %arg9[%c0_17, %c0_18], %32 {strides = array<i32>} : memref<8x32xf32, #tpu.memory_space<vmem>>, vector<8x32xf32>,
    %c0_19 = arith.constant 0 : index
    %c0_20 = arith.constant 0 : index
    %34 = vector.load %arg10[%c0_19, %c0_20] : memref<8x32xf32, #tpu.memory_space<vmem>>, vector<8x32xf32>
    tpu.vector_store %arg10[%c0_19, %c0_20], %29 {strides = array<i32>} : memref<8x32xf32, #tpu.memory_space<vmem>>, vector<8x32xf32>,
    %c0_21 = arith.constant 0 : index
    %c0_22 = arith.constant 0 : index
    %c0_23 = arith.constant 0 : index
    %35 = vector.load %arg6[%c0_21, %c0_22, %c0_23] : memref<1x8x32xf32, #tpu.memory_space<vmem>>, vector<1x8x32xf32>
    %36 = vector.shape_cast %35 : vector<1x8x32xf32> to vector<8x32xf32>
    %37 = vector.shape_cast %32 : vector<8x32xf32> to vector<1x8x32xf32>
    tpu.vector_store %arg6[%c0_21, %c0_22, %c0_23], %37 {strides = array<i32>} : memref<1x8x32xf32, #tpu.memory_space<vmem>>, vector<1x8x32xf32>,
    %c0_24 = arith.constant 0 : index
    %c0_25 = arith.constant 0 : index
    %c0_26 = arith.constant 0 : index
    %38 = vector.load %arg7[%c0_24, %c0_25, %c0_26] : memref<1x8x32xf32, #tpu.memory_space<vmem>>, vector<1x8x32xf32>
    %39 = vector.shape_cast %38 : vector<1x8x32xf32> to vector<8x32xf32>
    %40 = vector.shape_cast %29 : vector<8x32xf32> to vector<1x8x32xf32>
    tpu.vector_store %arg7[%c0_24, %c0_25, %c0_26], %40 {strides = array<i32>} : memref<1x8x32xf32, #tpu.memory_space<vmem>>, vector<1x8x32xf32>,
    return
  }
  func.func @transform_0(%arg0: i32) -> (i32, i32) {
    %c0_i32 = arith.constant 0 : i32
    %c0_i32_0 = arith.constant 0 : i32
    %c0_i32_1 = arith.constant 0 : i32
    return %c0_i32, %c0_i32_0 : i32, i32
  }
  func.func @transform_1(%arg0: i32) -> (i32, i32) {
    %c0_i32 = arith.constant 0 : i32
    %c0_i32_0 = arith.constant 0 : i32
    %c0_i32_1 = arith.constant 0 : i32
    return %c0_i32, %c0_i32_0 : i32, i32
  }
  func.func @transform_2(%arg0: i32) -> (i32, i32, i32) {
    %c0_i32 = arith.constant 0 : i32
    %c0_i32_0 = arith.constant 0 : i32
    %c0_i32_1 = arith.constant 0 : i32
    return %arg0, %c0_i32, %c0_i32_0 : i32, i32, i32
  }
  func.func @transform_3(%arg0: i32) -> (i32, i32) {
    %c0_i32 = arith.constant 0 : i32
    %c0_i32_0 = arith.constant 0 : i32
    %c0_i32_1 = arith.constant 0 : i32
    return %c0_i32, %c0_i32_0 : i32, i32
  }
  func.func @transform_4(%arg0: i32) -> (i32, i32) {
    %c0_i32 = arith.constant 0 : i32
    %c0_i32_0 = arith.constant 0 : i32
    %c0_i32_1 = arith.constant 0 : i32
    return %c0_i32, %c0_i32_0 : i32, i32
  }
  func.func @transform_5(%arg0: i32) -> (i32, i32, i32) {
    %c0_i32 = arith.constant 0 : i32
    %c0_i32_0 = arith.constant 0 : i32
    %c0_i32_1 = arith.constant 0 : i32
    return %arg0, %c0_i32, %c0_i32_0 : i32, i32, i32
  }
  func.func @transform_6(%arg0: i32) -> (i32, i32, i32) {
    %c0_i32 = arith.constant 0 : i32
    %c0_i32_0 = arith.constant 0 : i32
    %c0_i32_1 = arith.constant 0 : i32
    return %arg0, %c0_i32, %c0_i32_0 : i32, i32, i32
  }
}

</mosaic_0001>

<bundles_post_ra>
// kernel: tpu_custom_call.1
= control target key start
LH: loop header
LB: loop body
LE: loop exit
PB: predicated region body
PF: predicated region fallthrough
CT: control target
= control target key end

     0   :  { %12 = vsyncpa [#allocation6], 0  ;;  %s1228_s0 = inlined_call_operand.hbm [shape: f32[8,32], index: 0, kind: input, shape index: {}]   ;;  %s1229_s1 = inlined_call_operand.hbm [shape: f32[8,32], index: 1, kind: input, shape index: {}]   ;;  %s1230_s2 = inlined_call_operand.hbm [shape: f32[8,8,32], index: 2, kind: input, shape index: {}]   ;;  %s1231_s3 = inlined_call_operand.hbm [shape: f32[64,160], index: 3, kind: input, shape index: {}]   ;;  %s1232_s4 = inlined_call_operand.vmem [shape: f32[1,160], index: 4, kind: input, shape index: {}]   ;;  %s1233_s5 = inlined_call_operand.hbm [shape: f32[8,8,32], index: 5, kind: output, shape index: {0}]   ;;  %s1234_s6 = inlined_call_operand.hbm [shape: f32[8,8,32], index: 6, kind: output, shape index: {1}]  }
   0x1   :  { %13 = vsyncpa [#allocation9], 0 }
   0x2   :  { %14 = vsyncpa [#allocation7], 0 }
   0x3   :  { %16 = vsyncpa [#allocation7 + $0x1], 0 }
   0x4   :  { %17 = vsyncpa [#allocation14], 0 }
   0x5   :  { %19 = vsyncpa [#allocation14 + $0x1], 0  ;;  %s1021_s21 = smov 0   ;;  %s1023_s22 = smov 0  }
   0x6   :  { %s1025_s23 = smov 0   ;;  %s1027_s24 = smov 0  }
   0x7 LB: > { %s1042_s25 = sadd.s32 4294967295, %s976_s24   ;;  %s626_s26 = sadd.s32 4294967294, %s976_s24   ;;  %s976_s24 = sphi %s1027_s24, %s1249_s24   ;;  %s972_s23 = sphi %s1025_s23, %s1248_s23   ;;  %s968_s22 = sphi %s1023_s22, %s1247_s22   ;;  %s964_s21 = sphi %s1021_s21, %s1246_s21  }
   0x8   : > { %p87_p0 = scmp.ne.s32.totalorder %s968_s22, %s964_s21  ;;  %p88_p1 = scmp.eq.s32.totalorder %s1042_s25, 0 }
   0x9   : > { %p153_p2 = scmp.eq.s32.totalorder %s1042_s25, 7  ;;  %p159_p3 = scmp.eq.s32.totalorder %s626_s26, 7 }
   0xa   : > { %p1051_p4 = por %p88_p1, %p87_p0  ;;  %p627_p5 = scmp.ge.s32.totalorder %s976_s24, 1 }
   0xb   : > { %p1056_p6 = por %p159_p3, %p87_p0  ;;  %p192_p7 = scmp.lt.s32.totalorder %s976_s24, 9 }
   0xc   : > { %s204_s7 = sshll.u32 %s1228_s0, 4  ;;  %s978_s9 = smov [#allocation5]   ;;  %s205_s7 = int_to_ptr.hbm [resolvable:$true] %s204_s7 }
   0xd   : > { %p1065_p9 = pnand %p627_p5, %p192_p7  ;;  %s206_s10 = sshll.u32 %s978_s9, 4  ;;  %s207_s10 = int_to_ptr.vmem [resolvable:$true] %s206_s10 }
   0xe   : > { %s216_s13 = sshll.u32 %s1229_s1, 4  ;;  %s227_s17 = sshll.u32 %s1231_s3, 4  ;;  %s217_s13 = int_to_ptr.hbm [resolvable:$true] %s216_s13  ;;  %s228_s17 = int_to_ptr.hbm [resolvable:$true] %s227_s17 }
   0xf   : > { %p669_p10 = pneg %p1065_p9  ;;  %s979_s18 = smov [#allocation8]  }
  0x10   : > { %s218_s19 = sshll.u32 %s979_s18, 4  ;;  %s980_s20 = smov [#allocation11]   ;;  %s219_s19 = int_to_ptr.vmem [resolvable:$true] %s218_s19 }
  0x11   : > { %p1076_p11 = pnand %p669_p10, %p88_p1  ;;  %s229_s26 = sshll.u32 %s980_s20, 4  ;;  %s230_s26 = int_to_ptr.vmem [resolvable:$true] %s229_s26 }
  0x12   : > { %s981_s29 = smov 256   ;;  %s982_s30 = smov 16  }
  0x13   : > { %672 = dma.hbm_to_vmem [thread:$0]  (!%p1076_p11), %s205_s7, 128, %s207_s10, [#allocation6]  }
  0x14   : > { %675 = dma.hbm_to_vmem [thread:$0]  (!%p1076_p11), %s217_s13, 128, %s219_s19, [#allocation9]  }
  0x15   : > { %678 = dma.hbm_to_vmem [thread:$0]  (!%p1076_p11), %s228_s17, 2048, %s230_s26, [#allocation9], %s981_s29, %s981_s29, %s982_s30  }
  0x16   : > { %s1090_s9 = sadd.s32 1, %s976_s24   ;;  %s74_s10 = sadd.s32 1, %s972_s23 }
  0x17   : > { %s71_s7 = ssub.s32 %s976_s24, %s1090_s9  ;;  %p81_p13 = scmp.ne.s32.totalorder %s972_s23, %s968_s22 }
  0x18   : > { %p72_p12 = scmp.eq.s32.totalorder %s71_s7, 0  ;;  %p82_p0 = scmp.eq.s32.totalorder %s976_s24, 0 }
  0x19   : > { %p693_p3 = scmp.lt.s32.totalorder %s976_s24, 8  ;;  %p1104_p7 = por %p153_p2, %p81_p13 }
  0x1a   : > { %s1100_s11 = scalar_select %p72_p12, %s972_s23, %s74_s10  }
  0x1b   : > { %p83_p5 = por %p82_p0, %p81_p13  ;;  %s246_s13 = sand.u32 1, %s976_s24  }
  0x1c   : > { %s248_s14 = sand.u32 1, %s972_s23   ;;  %s633_s16 = sshll.u32 %s976_s24, 3 }
  0x1d   : > { %s632_s15 = sshll.u32 %s248_s14, 3  ;;  %s254_s19 = scalar_lea.hbm %s1230_s2, %s633_s16 }
  0x1e   : > { %s250_s20 = scalar_lea.vmem [#allocation10], %s632_s15  ;;  %s256_s29 = sshll.u32 %s254_s19, 4  ;;  %s257_s29 = int_to_ptr.hbm [resolvable:$true] %s256_s29 }
  0x1f   : > { %s258_s26 = sshll.u32 %s250_s20, 4  ;;  %p1116_p10 = pnand %p693_p3, %p83_p5  ;;  %s259_s26 = int_to_ptr.vmem [resolvable:$true] %s258_s26 }
  0x20   : > { %s247_s7 = scalar_lea.sflag [#allocation6], %s246_s13  ;;  %s836_s10 = sshra.s32 %s257_s29, 4  ;;  %s837_s10 = int_to_ptr.hbm [resolvable:$true] %s836_s10 }
  0x21   : > { %s838_s14 = scalar_lea.hbm %s837_s10, 8  ;;  %p840_p11 = pneg %p1116_p10 }
  0x22   : > { %p839_p2 = scmp.ne.s32.totalorder %s837_s10, %s838_s14  ;;  %s843_s17 = scalar_lea.hbm %s1230_s2, 64 }
  0x23   : > { %p844_p0 = scmp.lt.s32.totalorder %s837_s10, %s1230_s2  ;;  %p845_p3 = scmp.lt.s32.totalorder %s843_s17, %s838_s14 }
  0x24   : > { %p841_p12 = pnand %p840_p11, %p839_p2 }
  0x25   : > { %p846_p5 = por %p845_p3, %p844_p0 }
  0x26   : > { %p842_p13 = pneg %p841_p12 }
  0x28   : > { %p847_p8 = pnand %p846_p5, %p842_p13 }
  0x2a   : > { %850 = shalt.err (!%p847_p8)
}
  0x2b   : > { %682 = dma.hbm_to_vmem [thread:$0]  (!%p1116_p10), %s257_s29, 128, %s259_s26, %s247_s7  }
  0x2c   : > { %267 = sbr.rel (%p1065_p9) target bundleno = 787 (0x313), region = 40 }
  0x31   : > { %939 = dma.done.wait (%p88_p1), [#allocation6], 128  }
  0x32   : > { %941 = vsyncadd (%p88_p1), [#allocation6], 4294967168 }
  0x33   : > { %943 = dma.done.wait (%p88_p1), [#allocation9], 128  }
  0x34   : > { %945 = vsyncadd (%p88_p1), [#allocation9], 4294967168  ;;  %s279_s13 = sand.u32 1, %s1042_s25   ;;  %s1142_s20 = sand.u32 1, %s968_s22  }
  0x35   : > { %s1145_s8 = sshll.u32 %s1142_s20, 3  ;;  %s280_s26 = scalar_lea.sflag [#allocation6], %s279_s13 }
  0x36   : > { %s283_s29 = scalar_lea.vmem [#allocation10], %s1145_s8 }
  0x37   : > { %947 = dma.done.wait (%p1051_p4), %s280_s26, 128  }
  0x38   : > { %949 = vsyncadd (%p1051_p4), %s280_s26, 4294967168 }
  0x39   : > { %951 = dma.done.wait (%p88_p1), [#allocation9], 2048  }
  0x3a   : > { %953 = vsyncadd (%p88_p1), [#allocation9], 4294965248  ;;  %s322_s7 = scalar_lea.vmem [#allocation13], %s1145_s8  ;;  %p1242_p8 = scmp.ne.s32.totalorder %s1042_s25, 0 }
  0x3c   : > { %326 = sbr.rel (%p1242_p8) target bundleno = 68 (0x44), region = 60 }
  0x41   : > { %v327_v0 = vld [vmem:[#allocation5] sm:$0xff]  ;;  %vm328_vm0 = vcmask 261120   ;;  %v330_v1 = vld [vmem:[#allocation8] sm:$0xff] }
  0x42   : > { %329 = vst.msk [vmem:[#allocation3] sm:$0xff] %vm328_vm0, %v327_v0 }
  0x43   : > { %331 = vst.msk [vmem:[#allocation4] sm:$0xff] %vm328_vm0, %v330_v1 }
  0x44 PF: > { %v357_v3 = vld [vmem:[#allocation11 + $0x70] sm:$0xff]  ;;  %v358_v4 = vld [vmem:[#allocation11 + $0x78] sm:$0xff]  ;;  %s983_s27 = smov 32   ;;  %v355_v5 = vld [vmem:[#allocation11 + $0x60] sm:$0xff]  ;;  %vm333_vm1 = vcmask 261120   ;;  %vm340_vm2 = vcmask 523520  }
  0x45   : > { %377 = vmatpush.msra.mxu0 %v357_v3  ;;  %v356_v6 = vld [vmem:[#allocation11 + $0x68] sm:$0xff]  ;;  %397 = vmatpush.msra.mxu1 %v358_v4  ;;  %v353_v7 = vld [vmem:[#allocation11 + $0x50] sm:$0xff]  ;;  %v354_v8 = vld [vmem:[#allocation11 + $0x58] sm:$0xff]  ;;  %vm365_vm3 = vcmask 523264   ;;  %s1235_s15 = smov 64   ;;  %s985_s16 = smov 96  }
  0x46   : > { %v351_v9 = vld [vmem:[#allocation11 + $0x40] sm:$0xff]  ;;  %v352_v10 = vld [vmem:[#allocation11 + $0x48] sm:$0xff]  ;;  %v332_v11 = vld [vmem:[%s283_s29] sm:$0xff]  ;;  %s647_s17 = sshll.u32 %s1042_s25, 3  ;;  %s492_s26 = sshll.u32 %s322_s7, 4  ;;  %s493_s26 = int_to_ptr.vmem [resolvable:$true] %s492_s26 }
  0x47   : > { %378 = vmatpush.msra.mxu0 %v355_v5  ;;  %398 = vmatpush.msra.mxu1 %v356_v6  ;;  %334 = vst.msk [vmem:[#allocation2] sm:$0xff] %vm333_vm1, %v332_v11  ;;  %v349_v12 = vld [vmem:[#allocation11 + $0x30] sm:$0xff]  ;;  %v350_v13 = vld [vmem:[#allocation11 + $0x38] sm:$0xff]  ;;  %v347_v14 = vld [vmem:[#allocation11 + $0x20] sm:$0xff]  ;;  %s490_s13 = scalar_lea.hbm %s1234_s6, %s647_s17  ;;  %s886_s25 = scalar_lea.hbm %s1234_s6, 64 }
  0x48   : > { %v348_v15 = vld [vmem:[#allocation11 + $0x28] sm:$0xff]  ;;  %v345_v16 = vld [vmem:[#allocation11 + $0x10] sm:$0xff]  ;;  %v346_v17 = vld [vmem:[#allocation11 + $0x18] sm:$0xff]  ;;  %s494_s29 = sshll.u32 %s490_s13, 4  ;;  %s495_s29 = int_to_ptr.hbm [resolvable:$true] %s494_s29 }
  0x49   : > { %v335_v2 = vld [vmem:[#allocation3] sm:$0xff]  ;;  %379 = vmatpush.msra.mxu0 %v353_v7  ;;  %399 = vmatpush.msra.mxu1 %v354_v8  ;;  %v343_v18 = vld [vmem:[#allocation11] sm:$0xff]  ;;  %v344_v19 = vld [vmem:[#allocation11 + $0x8] sm:$0xff]  ;;  %s880_s10 = sshra.s32 %s495_s29, 4  ;;  %s881_s10 = int_to_ptr.hbm [resolvable:$true] %s880_s10 }
  0x4a   : > { %337 = vrot.lane.b32.xlu0 %v335_v2, %s983_s27  ;;  %v359_v22 = vld [vmem:[%s1232_s4] sm:$0x3]  ;;  %v429_v45 = vld [vmem:[#allocation4] sm:$0xff]  ;;  %s466_s27 = scalar_lea.sflag [#allocation14], %s1142_s20  ;;  %s882_s14 = scalar_lea.hbm %s881_s10, 8 }
  0x4b   : > { %380 = vmatpush.msra.mxu0 %v351_v9  ;;  %400 = vmatpush.msra.mxu1 %v352_v10  ;;  %v361_v23 = vperm.slane %v359_v22, 0  ;;  %v362_v24 = vperm.slane %v359_v22, 1  ;;  %p883_p1 = scmp.ne.s32.totalorder %s881_s10, %s882_s14  ;;  %p887_p10 = scmp.lt.s32.totalorder %s881_s10, %s1234_s6 }
  0x4c   : > { %p888_p2 = scmp.lt.s32.totalorder %s886_s25, %s882_s14 }
  0x4d   : > { %381 = vmatpush.msra.mxu0 %v349_v12  ;;  %401 = vmatpush.msra.mxu1 %v350_v13  ;;  %p884_p4 = pnand %p883_p1, %p1104_p7 }
  0x4e   : > { %p889_p11 = por %p888_p2, %p887_p10 }
  0x4f   : > { %382 = vmatpush.msra.mxu0 %v347_v14  ;;  %402 = vmatpush.msra.mxu1 %v348_v15  ;;  %p885_p9 = pneg %p884_p4 }
  0x51   : > { %383 = vmatpush.msra.mxu0 %v345_v16  ;;  %403 = vmatpush.msra.mxu1 %v346_v17  ;;  %p890_p12 = pnand %p889_p11, %p885_p9 }
  0x53   : > { %384 = vmatpush.msra.mxu0 %v343_v18  ;;  %404 = vmatpush.msra.mxu1 %v344_v19 }
  0xbc   : > { %v338_v20 = vpop.permute.xlu0 %337 }
  0xbd   : > { %341 = vst.msk [vmem:[#allocation2] sm:$0xff] %vm340_vm2, %v338_v20 }
  0xc4   : > { %v342_v21 = vld [vmem:[#allocation2] sm:$0xff] }
  0xc5   : > { %642 = vmatmul.msk.f32.vlgmr.msra.gmra.mxu0 %vm365_vm3, %v342_v21  ;;  %643 = vmatmul.msk.f32.vlgmr.msra.gmra.mxu1 %vm365_vm3, %v342_v21 }
 0x142   : > { %v386_v25 = vpop.f32.mrf.mxu0  ;;  %v406_v26 = vpop.f32.mrf.mxu1 }
 0x143   : > { %v387_v27 = vadd.f32 %v386_v25, %v361_v23  ;;  %v407_v28 = vadd.f32 %v406_v26, %v362_v24 }
 0x145   : > { %738 = vtanh.f32 %v387_v27  ;;  %448 = vrot.lane.b32.xlu2 %v407_v28, %s1235_s15  ;;  %v644_v30 = vmul.f32 -1.442695, %v387_v27 }
 0x147   : > { %740 = vpow2.f32 %v644_v30 }
 0x14b   : > { %v739_v29 = vpop.eup %738 }
 0x14c   : > { %432 = vrot.lane.b32.xlu0 %v739_v29, %s1235_s15 }
 0x14d   : > { %v741_v31 = vpop.eup %740 }
 0x14e   : > { %v412_v32 = vadd.f32 1.0, %v741_v31 }
 0x150   : > { %742 = vrcp.f32 %v412_v32  ;;  %v424_v38 = vand.u32 2147483648, %v412_v32  ;;  %vm418_vm5 = vweird.f32 %v412_v32  ;;  %v422_v39 = vand.u32 2147483647, %v412_v32 }
 0x152   : > { %v425_v41 = vor.u32 1.1754944e-38, %v424_v38  ;;  %vm423_vm7 = vcmp.eq.f32.partialorder %v422_v39, 8.507059e+37 }
 0x156   : > { %v743_v33 = vpop.eup %742 }
 0x157   : > { %v414_v34 = vmul.f32 %v743_v33, %v412_v32  ;;  %vm419_vm4 = vweird.f32 %v743_v33 }
 0x158   : > { %vm420_vm6 = vmor %vm418_vm5, %vm419_vm4 }
 0x159   : > { %v415_v35 = vsub.f32 1.0, %v414_v34 }
 0x15b   : > { %v416_v36 = vmul.f32 %v743_v33, %v415_v35 }
 0x15d   : > { %v417_v37 = vadd.f32 %v743_v33, %v416_v36 }
 0x15f   : > { %v421_v40 = vsel %vm420_vm6, %v743_v33, %v417_v37 }
 0x160   : > { %v426_v43 = vsel %vm423_vm7, %v425_v41, %v421_v40 }
 0x161   : > { %v430_v46 = vmul.f32 %v429_v45, %v426_v43 }
 0x1be   : > { %v433_v42 = vpop.permute.xlu0 %432 }
 0x1bf   : > { %v435_v44 = vmul.f32 %v433_v42, %v426_v43 }
 0x1c1   : > { %437 = vrot.lane.b32.xlu1 %v435_v44, %s985_s16 }
 0x233   : > { %v438_v47 = vpop.permute.xlu1 %437 }
 0x234   : > { %v440_v48 = vadd.f32 %v438_v47, %v430_v46 }
 0x236   : > { %744 = vtanh.f32 %v440_v48  ;;  %457 = vst.msk [vmem:[#allocation4] sm:$0xff] %vm333_vm1, %v440_v48 }
 0x237   : > { %459 = vst.msk [vmem:[%s322_s7] sm:$0xff] %vm333_vm1, %v440_v48 }
 0x23c   : > { %v745_v49 = vpop.eup %744 }
 0x23d   : > { %443 = vrot.lane.b32.xlu1 %v745_v49, %s1235_s15 }
 0x23e   : > { %893 = shalt.err (!%p890_p12)
}
 0x23f   : > { %666 = dma.vmem_to_hbm [thread:$0]  (%p1104_p7), %s493_s26, 128, %s495_s29, %s466_s27   ;;  %v449_v52 = vpop.permute.xlu2 %448 }
 0x240   : > { %s1243_s30 = smov 64   ;;  %s476_s19 = scalar_lea.hbm %s1233_s5, %s647_s17 }
 0x241   : > { %s1244_s13 = scalar_lea.vmem [#allocation12], %s1145_s8  ;;  %s480_s14 = sshll.u32 %s476_s19, 4  ;;  %s481_s14 = int_to_ptr.hbm [resolvable:$true] %s480_s14 }
 0x242   : > { %s478_s10 = sshll.u32 %s1244_s13, 4  ;;  %s1245_s26 = smov %s1244_s13  ;;  %s479_s10 = int_to_ptr.vmem [resolvable:$true] %s478_s10 }
 0x243   : > { %s461_s29 = scalar_lea.sflag [#allocation7], %s1142_s20  ;;  %s908_s27 = sshra.s32 %s481_s14, 4  ;;  %s909_s27 = int_to_ptr.hbm [resolvable:$true] %s908_s27 }
 0x244   : > { %s910_s16 = scalar_lea.hbm %s909_s27, 8  ;;  %s914_s18 = scalar_lea.hbm %s1233_s5, 64 }
 0x245   : > { %p911_p13 = scmp.ne.s32.totalorder %s909_s27, %s910_s16  ;;  %p915_p5 = scmp.lt.s32.totalorder %s909_s27, %s1233_s5 }
 0x246   : > { %p916_p8 = scmp.lt.s32.totalorder %s914_s18, %s910_s16 }
 0x247   : > { %p912_p0 = pnand %p911_p13, %p1104_p7 }
 0x248   : > { %p917_p1 = por %p916_p8, %p915_p5 }
 0x249   : > { %p913_p3 = pneg %p912_p0 }
 0x24b   : > { %p918_p4 = pnand %p917_p1, %p913_p3 }
 0x2af   : > { %v444_v50 = vpop.permute.xlu1 %443 }
 0x2b0   : > { %v446_v51 = vmul.f32 %v444_v50, %v426_v43 }
 0x2b2   : > { %v451_v53 = vadd.f32 %v449_v52, %v446_v51 }
 0x2b4   : > { %453 = vrot.lane.b32.xlu2 %v451_v53, %s1243_s30 }
 0x30e   : > { %v454_v54 = vpop.permute.xlu2 %453 }
 0x30f   : > { %456 = vst.msk [vmem:[#allocation3] sm:$0xff] %vm333_vm1, %v454_v54 }
 0x310   : > { %458 = vst.msk [vmem:[%s1245_s26] sm:$0xff] %vm333_vm1, %v454_v54 }
 0x311   : > { %921 = shalt.err (!%p918_p4)
}
 0x312   : > { %665 = dma.vmem_to_hbm [thread:$0]  (%p1104_p7), %s479_s10, 128, %s481_s14, %s461_s29  }
 0x313 PF: > { %p697_p9 = scmp.ge.s32.totalorder %s976_s24, 2  ;;  %s506_s20 = sand.u32 1, %s964_s21  }
 0x314   : > { %s507_s8 = scalar_lea.sflag [#allocation7], %s506_s20 }
 0x315   : > { %p684_p10 = pnand %p697_p9, %p1056_p6 }
 0x317   : > { %p685_p2 = pneg %p684_p10 }
 0x319   : > { %955 = dma.done.wait (%p685_p2), %s507_s8, 128  }
 0x31a   : > { %957 = vsyncadd (%p685_p2), %s507_s8, 4294967168  ;;  %s517_s15 = scalar_lea.sflag [#allocation14], %s506_s20 }
 0x31b   : > { %959 = dma.done.wait (%p685_p2), %s517_s15, 128  }
 0x31c   : > { %961 = vsyncadd (%p685_p2), %s517_s15, 4294967168  ;;  %p22_p7 = scmp.ge.s32.totalorder %s1090_s9, 10   ;;  %s1246_s21 = smov %s968_s22 }
 0x31d   : > { %s1247_s22 = smov %s972_s23  ;;  %s1248_s23 = smov %s1100_s11 }
 0x31e   : > { %s1249_s24 = smov %s1090_s9  ;;  %24 = sbr.rel (!%p22_p7) target bundleno = 7 (0x7), region = 117 }
 0x323   :  { %523 = vsyncpa [#allocation6], 1 }
 0x324   :  { %525 = vsyncpa [#allocation6 + $0x1], 1 }
 0x325   :  { %526 = vsyncpa [#allocation9], 1 }
 0x326   :  { %527 = vsyncpa [#allocation7], 1 }
 0x327   :  { %529 = vsyncpa [#allocation7 + $0x1], 1 }
 0x328   :  { %530 = vsyncpa [#allocation14], 1 }
 0x329   :  { %532 = vsyncpa [#allocation14 + $0x1], 1 }

</bundles_post_ra>
